<compile_context>
chip_gen: v7x
topology: tpu7x:2x2x1
jax: 0.10.0
libtpu: 0.0.40
codegen_flags: <defaults>
</compile_context>

<pallas_src>
import jax
import jax.numpy as jnp
from jax.experimental import pallas as pl
from jax.experimental.pallas import tpu as pltpu

IN_DIM = 28 * 28   # 784
H1 = 512
H2 = 256
OUT_DIM = 1
NEG_SLOPE = 0.2


def _disc_kernel(x_ref, w1_ref, b1_ref, w2_ref, b2_ref, w3_ref, b3_ref, o_ref):
    # ---- Layer 1: cast x f32 -> bf16 on the VPU (saves an HBM round trip in
    # the wrapper), bf16 MXU matmul with f32 accumulation. ----
    x = x_ref[...].astype(jnp.bfloat16)                               # (TB, 784)
    h1 = jnp.dot(x, w1_ref[...], preferred_element_type=jnp.float32)  # (TB, 512) f32
    h1 = h1 + b1_ref[...]
    h1 = jnp.maximum(h1, NEG_SLOPE * h1)                              # LeakyReLU(0.2)
    # Dropout(0.3): identity in eval mode.

    # ---- Layer 2: bf16 MXU matmul, f32 accumulation. ----
    h2 = jnp.dot(h1.astype(jnp.bfloat16), w2_ref[...],
                 preferred_element_type=jnp.float32)                  # (TB, 256) f32
    h2 = h2 + b2_ref[...]
    h2 = jnp.maximum(h2, NEG_SLOPE * h2)                              # LeakyReLU(0.2)

    # ---- Layer 3 (256 -> 1): N=1 MXU matmul would waste a full pass, so do a
    # VPU broadcast-multiply + XLU cross-lane reduce. w3_ref is W3^T, (1, 256).
    h3 = jnp.sum(h2 * w3_ref[...], axis=-1, keepdims=True) + b3_ref[...]   # (TB, 1)

    # Sigmoid via tanh (EUP): sigmoid(x) = 0.5*(tanh(x/2)+1). Narrow (TB, 1)
    # store: only 4 B/row of output HBM traffic, no wrapper slice pass needed.
    o_ref[...] = 0.5 * (jnp.tanh(0.5 * h3) + 1.0)


def _tiling(batch):
    """Return (tile_rows, padded_batch).

    <=1024 rows: a single sublane-aligned tile (one grid step).
    >1024 rows: ~<=1024-row, 256-aligned tiles with an EVEN number of grid
    steps so the 'parallel' batch axis splits evenly across v7x's 2 TCs.
    """
    if batch <= 1024:
        tb = max(8, pl.cdiv(batch, 8) * 8)
        return tb, tb
    steps = 2 * pl.cdiv(batch, 2048)                     # even, >= 2
    tb = pl.cdiv(pl.cdiv(batch, steps), 256) * 256       # MXU-M aligned
    return tb, tb * steps


@jax.jit
def discriminator_forward(x, w1, b1, w2, b2, w3, b3):
    """x: (B, 784) float32 -> (B, 1) float32 in (0, 1)."""
    B = x.shape[0]
    tb, Bp = _tiling(B)
    if Bp != B:
        x = jnp.pad(x, ((0, Bp - B), (0, 0)))

    # One-time weight casts: bf16 is the full-rate MXU dtype on v5e/v6e/v7x and
    # halves resident weight VMEM. x itself stays f32 (cast happens in-kernel).
    w1_bf16 = w1.astype(jnp.bfloat16)
    w2_bf16 = w2.astype(jnp.bfloat16)
    w3_t = w3.reshape(1, H2)            # (256, 1) -> (1, 256), stays f32

    grid = (Bp // tb,)

    flops = Bp * 2 * (IN_DIM * H1 + H1 * H2 + H2 * OUT_DIM)
    bytes_accessed = (
        Bp * IN_DIM * 4                       # x (f32, cast to bf16 in-kernel)
        + (IN_DIM * H1 + H1 * H2) * 2         # bf16 weights
        + (H1 + H2 + H2 + OUT_DIM) * 4        # f32 biases + W3^T
        + Bp * OUT_DIM * 4                    # (Bp, 1) f32 output
    )

    out = pl.pallas_call(
        _disc_kernel,
        out_shape=jax.ShapeDtypeStruct((Bp, OUT_DIM), jnp.float32),
        grid_spec=pltpu.PrefetchScalarGridSpec(
            num_scalar_prefetch=0,
            grid=grid,
            in_specs=[
                pl.BlockSpec((tb, IN_DIM), lambda i: (i, 0)),      # x tile (f32)
                pl.BlockSpec((IN_DIM, H1), lambda i: (0, 0)),      # W1 (resident, bf16)
                pl.BlockSpec((1, H1), lambda i: (0, 0)),           # b1 (f32)
                pl.BlockSpec((H1, H2), lambda i: (0, 0)),          # W2 (resident, bf16)
                pl.BlockSpec((1, H2), lambda i: (0, 0)),           # b2 (f32)
                pl.BlockSpec((1, H2), lambda i: (0, 0)),           # W3^T (f32)
                pl.BlockSpec((1, OUT_DIM), lambda i: (0, 0)),      # b3 (f32)
            ],
            out_specs=pl.BlockSpec((tb, OUT_DIM), lambda i: (i, 0)),
        ),
        compiler_params=pltpu.CompilerParams(
            dimension_semantics=("parallel",),
            vmem_limit_bytes=48 * 1024 * 1024,   # explicit: v7x has 64 MiB physical VMEM
        ),
        cost_estimate=pl.CostEstimate(
            flops=flops, transcendentals=Bp, bytes_accessed=bytes_accessed),
    )(x, w1_bf16, b1, w2_bf16, b2, w3_t, b3)

    return out[:B]


def init_params(key):
    """Deterministic PyTorch-style init: U(-1/sqrt(fan_in), 1/sqrt(fan_in))."""
    ks = jax.random.split(key, 6)

    def lin(kw, kb, fan_in, fan_out):
        bound = 1.0 / jnp.sqrt(fan_in)
        w = jax.random.uniform(kw, (fan_in, fan_out), jnp.float32, -bound, bound)
        b = jax.random.uniform(kb, (1, fan_out), jnp.float32, -bound, bound)
        return w, b

    w1, b1 = lin(ks[0], ks[1], IN_DIM, H1)
    w2, b2 = lin(ks[2], ks[3], H1, H2)
    w3, b3 = lin(ks[4], ks[5], H2, OUT_DIM)
    return w1, b1, w2, b2, w3, b3


def _reference(x, w1, b1, w2, b2, w3, b3):
    """Pure-JAX reference mirroring the kernel's bf16 quantization."""
    q = lambda a: a.astype(jnp.bfloat16).astype(jnp.float32)
    lrelu = lambda v: jnp.where(v > 0, v, NEG_SLOPE * v)
    h1 = lrelu(q(x) @ q(w1) + b1)
    h2 = lrelu(q(h1) @ q(w2) + b2)
    h3 = jnp.sum(h2 * w3.reshape(1, -1), axis=-1, keepdims=True) + b3
    return jax.nn.sigmoid(h3)


if __name__ == "__main__":
    key = jax.random.PRNGKey(0)
    k_x, k_p = jax.random.split(key)

    batch = 4
    x = jax.random.normal(k_x, (batch, IN_DIM), jnp.float32)
    params = init_params(k_p)

    out = discriminator_forward(x, *params)
    out = jax.block_until_ready(out)

    ref = _reference(x, *params)
    assert out.shape == (batch, OUT_DIM)
    assert jnp.allclose(out, ref, atol=1e-3, rtol=1e-3), (
        float(jnp.max(jnp.abs(out - ref))))

    print("KERNEL_OK")
</pallas_src>

<mosaic_0001>
module attributes {stable_mosaic.version = 11 : i64} {
  func.func @_disc_kernel(%arg0: i32, %arg1: memref<8x784xf32, #tpu.memory_space<vmem>>, %arg2: memref<784x512xbf16, #tpu.memory_space<vmem>>, %arg3: memref<1x512xf32, #tpu.memory_space<vmem>>, %arg4: memref<512x256xbf16, #tpu.memory_space<vmem>>, %arg5: memref<1x256xf32, #tpu.memory_space<vmem>>, %arg6: memref<1x256xf32, #tpu.memory_space<vmem>>, %arg7: memref<1x1xf32, #tpu.memory_space<vmem>>, %arg8: memref<8x1xf32, #tpu.memory_space<vmem>>) attributes {dimension_semantics = [#tpu.dimension_semantics<parallel>], iteration_bounds = array<i64: 1>, scalar_prefetch = 0 : i64, scratch_operands = 0 : i64, tpu.core_type = #tpu.core_type<tc>, window_params = [{transform_indices = @transform_0, window_bounds = array<i64: 8, 784>}, {pipeline_mode = #tpu.pipeline_mode<synchronous>, transform_indices = @transform_1, window_bounds = array<i64: 784, 512>}, {pipeline_mode = #tpu.pipeline_mode<synchronous>, transform_indices = @transform_2, window_bounds = array<i64: 1, 512>}, {pipeline_mode = #tpu.pipeline_mode<synchronous>, transform_indices = @transform_3, window_bounds = array<i64: 512, 256>}, {pipeline_mode = #tpu.pipeline_mode<synchronous>, transform_indices = @transform_4, window_bounds = array<i64: 1, 256>}, {pipeline_mode = #tpu.pipeline_mode<synchronous>, transform_indices = @transform_5, window_bounds = array<i64: 1, 256>}, {pipeline_mode = #tpu.pipeline_mode<synchronous>, transform_indices = @transform_6, window_bounds = array<i64: 1, 1>}, {transform_indices = @transform_7, window_bounds = array<i64: 8, 1>}]} {
    %c0 = arith.constant 0 : index
    %c0_0 = arith.constant 0 : index
    %0 = vector.load %arg1[%c0, %c0_0] : memref<8x784xf32, #tpu.memory_space<vmem>>, vector<8x784xf32>
    %1 = arith.truncf %0 : vector<8x784xf32> to vector<8x784xbf16>
    %c0_1 = arith.constant 0 : index
    %c0_2 = arith.constant 0 : index
    %2 = vector.load %arg2[%c0_1, %c0_2] : memref<784x512xbf16, #tpu.memory_space<vmem>>, vector<784x512xbf16>
    %cst = arith.constant dense<0.000000e+00> : vector<8x512xf32>
    %3 = tpu.matmul %1, %2, %cst {dimension_numbers = #tpu.dot_dimension_numbers<[1], [0], [0], [1], [0, 0, 1, 1], [], []>} : vector<8x784xbf16>, vector<784x512xbf16>, vector<8x512xf32> -> vector<8x512xf32>
    %c0_3 = arith.constant 0 : index
    %c0_4 = arith.constant 0 : index
    %4 = vector.load %arg3[%c0_3, %c0_4] : memref<1x512xf32, #tpu.memory_space<vmem>>, vector<1x512xf32>
    %5 = vector.broadcast %4 : vector<1x512xf32> to vector<8x512xf32>
    %6 = arith.addf %3, %5 : vector<8x512xf32>
    %cst_5 = arith.constant 2.000000e-01 : f32
    %7 = vector.broadcast %cst_5 : f32 to vector<8x512xf32>
    %8 = arith.mulf %7, %6 : vector<8x512xf32>
    %9 = arith.maximumf %6, %8 : vector<8x512xf32>
    %10 = arith.truncf %9 : vector<8x512xf32> to vector<8x512xbf16>
    %c0_6 = arith.constant 0 : index
    %c0_7 = arith.constant 0 : index
    %11 = vector.load %arg4[%c0_6, %c0_7] : memref<512x256xbf16, #tpu.memory_space<vmem>>, vector<512x256xbf16>
    %cst_8 = arith.constant dense<0.000000e+00> : vector<8x256xf32>
    %12 = tpu.matmul %10, %11, %cst_8 {dimension_numbers = #tpu.dot_dimension_numbers<[1], [0], [0], [1], [0, 0, 1, 1], [], []>} : vector<8x512xbf16>, vector<512x256xbf16>, vector<8x256xf32> -> vector<8x256xf32>
    %c0_9 = arith.constant 0 : index
    %c0_10 = arith.constant 0 : index
    %13 = vector.load %arg5[%c0_9, %c0_10] : memref<1x256xf32, #tpu.memory_space<vmem>>, vector<1x256xf32>
    %14 = vector.broadcast %13 : vector<1x256xf32> to vector<8x256xf32>
    %15 = arith.addf %12, %14 : vector<8x256xf32>
    %cst_11 = arith.constant 2.000000e-01 : f32
    %16 = vector.broadcast %cst_11 : f32 to vector<8x256xf32>
    %17 = arith.mulf %16, %15 : vector<8x256xf32>
    %18 = arith.maximumf %15, %17 : vector<8x256xf32>
    %c0_12 = arith.constant 0 : index
    %c0_13 = arith.constant 0 : index
    %19 = vector.load %arg6[%c0_12, %c0_13] : memref<1x256xf32, #tpu.memory_space<vmem>>, vector<1x256xf32>
    %20 = vector.broadcast %19 : vector<1x256xf32> to vector<8x256xf32>
    %21 = arith.mulf %18, %20 : vector<8x256xf32>
    %cst_14 = arith.constant dense<0.000000e+00> : vector<8xf32>
    %22 = vector.multi_reduction <add>, %21, %cst_14 [1] : vector<8x256xf32> to vector<8xf32>
    %23 = vector.shape_cast %22 : vector<8xf32> to vector<8x1xf32>
    %c0_15 = arith.constant 0 : index
    %c0_16 = arith.constant 0 : index
    %24 = vector.load %arg7[%c0_15, %c0_16] : memref<1x1xf32, #tpu.memory_space<vmem>>, vector<1x1xf32>
    %25 = vector.broadcast %24 : vector<1x1xf32> to vector<8x1xf32>
    %26 = arith.addf %23, %25 : vector<8x1xf32>
    %cst_17 = arith.constant 5.000000e-01 : f32
    %27 = vector.broadcast %cst_17 : f32 to vector<8x1xf32>
    %28 = arith.mulf %27, %26 : vector<8x1xf32>
    %29 = math.tanh %28 : vector<8x1xf32>
    %cst_18 = arith.constant 1.000000e+00 : f32
    %30 = vector.broadcast %cst_18 : f32 to vector<8x1xf32>
    %31 = arith.addf %29, %30 : vector<8x1xf32>
    %cst_19 = arith.constant 5.000000e-01 : f32
    %32 = vector.broadcast %cst_19 : f32 to vector<8x1xf32>
    %33 = arith.mulf %32, %31 : vector<8x1xf32>
    %c0_20 = arith.constant 0 : index
    %c0_21 = arith.constant 0 : index
    %34 = vector.load %arg8[%c0_20, %c0_21] : memref<8x1xf32, #tpu.memory_space<vmem>>, vector<8x1xf32>
    tpu.vector_store %arg8[%c0_20, %c0_21], %33 {strides = array<i32>} : memref<8x1xf32, #tpu.memory_space<vmem>>, vector<8x1xf32>,
    return
  }
  func.func @transform_0(%arg0: i32) -> (i32, i32) {
    %c0_i32 = arith.constant 0 : i32
    %c0_i32_0 = arith.constant 0 : i32
    return %arg0, %c0_i32 : i32, i32
  }
  func.func @transform_1(%arg0: i32) -> (i32, i32) {
    %c0_i32 = arith.constant 0 : i32
    %c0_i32_0 = arith.constant 0 : i32
    %c0_i32_1 = arith.constant 0 : i32
    return %c0_i32, %c0_i32_0 : i32, i32
  }
  func.func @transform_2(%arg0: i32) -> (i32, i32) {
    %c0_i32 = arith.constant 0 : i32
    %c0_i32_0 = arith.constant 0 : i32
    %c0_i32_1 = arith.constant 0 : i32
    return %c0_i32, %c0_i32_0 : i32, i32
  }
  func.func @transform_3(%arg0: i32) -> (i32, i32) {
    %c0_i32 = arith.constant 0 : i32
    %c0_i32_0 = arith.constant 0 : i32
    %c0_i32_1 = arith.constant 0 : i32
    return %c0_i32, %c0_i32_0 : i32, i32
  }
  func.func @transform_4(%arg0: i32) -> (i32, i32) {
    %c0_i32 = arith.constant 0 : i32
    %c0_i32_0 = arith.constant 0 : i32
    %c0_i32_1 = arith.constant 0 : i32
    return %c0_i32, %c0_i32_0 : i32, i32
  }
  func.func @transform_5(%arg0: i32) -> (i32, i32) {
    %c0_i32 = arith.constant 0 : i32
    %c0_i32_0 = arith.constant 0 : i32
    %c0_i32_1 = arith.constant 0 : i32
    return %c0_i32, %c0_i32_0 : i32, i32
  }
  func.func @transform_6(%arg0: i32) -> (i32, i32) {
    %c0_i32 = arith.constant 0 : i32
    %c0_i32_0 = arith.constant 0 : i32
    %c0_i32_1 = arith.constant 0 : i32
    return %c0_i32, %c0_i32_0 : i32, i32
  }
  func.func @transform_7(%arg0: i32) -> (i32, i32) {
    %c0_i32 = arith.constant 0 : i32
    %c0_i32_0 = arith.constant 0 : i32
    return %arg0, %c0_i32 : i32, i32
  }
}

</mosaic_0001>

<bundles_post_ra>
// kernel: discriminator_forward.1
= control target key start
LH: loop header
LB: loop body
LE: loop exit
PB: predicated region body
PF: predicated region fallthrough
CT: control target
= control target key end

     0   :  { %vm1241_vm0 = vcmask 130048   ;;  %vm2096_vm1 = vcmask 7168   ;;  %s3701_s1 = inlined_call_operand.vmem [shape: bf16[784,512], index: 1, kind: input, shape index: {}]   ;;  %s3702_s0 = inlined_call_operand.vmem [shape: f32[8,784], index: 0, kind: input, shape index: {}]   ;;  %s3703_s3 = inlined_call_operand.vmem [shape: bf16[512,256], index: 3, kind: input, shape index: {}]   ;;  %s3704_s2 = inlined_call_operand.vmem [shape: f32[1,512], index: 2, kind: input, shape index: {}]   ;;  %s3705_s6 = inlined_call_operand.<no memory space> [shape: f32[1,1], index: 6, kind: input, shape index: {}]   ;;  %s3706_s4 = inlined_call_operand.vmem [shape: f32[1,256], index: 4, kind: input, shape index: {}]   ;;  %s3707_s5 = inlined_call_operand.vmem [shape: f32[1,256], index: 5, kind: input, shape index: {}]   ;;  %s3708_s7 = inlined_call_operand.vmem [shape: f32[8,1], index: 7, kind: output, shape index: {}]  }
   0x1   :  { %v2398_v0 = vld [vmem:[%s3701_s1 + $0x4] ss:$16 sps:$4 sm:$0xff]   ;;  %v2402_v2 = vld [vmem:[%s3701_s1] ss:$16 sps:$4 sm:$0xff]   ;;  %v30_v46 = vld [vmem:[%s3702_s0 + $0x8] sm:$0xff] }
   0x2   :  { %v2400_v1 = vld [vmem:[%s3701_s1 + $0x204] ss:$16 sps:$4 sm:$0xff]   ;;  %1245 = vmatprep.subr.bf16.mxu1 %v2398_v0  ;;  %v2403_v3 = vld [vmem:[%s3701_s1 + $0x200] ss:$16 sps:$4 sm:$0xff]   ;;  %v2975_v48 = vpack.c.bf16 %v30_v46, %v30_v46  ;;  %v32_v49 = vld [vmem:[%s3702_s0 + $0x18] sm:$0xff] }
   0x3   :  { %1286 = vmatprep.subr.bf16.mxu0 %v2400_v1  ;;  %v2404_v4 = vld [vmem:[%s3701_s1 + $0x24] ss:$16 sps:$4 sm:$0xff]   ;;  %1246 = vmatpush1.bf16.msra.mxu1 %v2402_v2  ;;  %v2408_v6 = vld [vmem:[%s3701_s1 + $0x20] ss:$16 sps:$4 sm:$0xff]   ;;  %v2986_v52 = vpack.c.bf16 %v32_v49, %v32_v49  ;;  %v2551_v49 = vld [vmem:[%s3701_s1 + $0x128] ss:$16 sps:$4 sm:$0xff]  }
   0x4   :  { %1287 = vmatpush1.bf16.msra.mxu0 %v2403_v3  ;;  %v2406_v5 = vld [vmem:[%s3701_s1 + $0x224] ss:$16 sps:$4 sm:$0xff]   ;;  %1247 = vmatprep.subr.bf16.mxu1 %v2404_v4  ;;  %v2409_v7 = vld [vmem:[%s3701_s1 + $0x220] ss:$16 sps:$4 sm:$0xff]  }
   0x5   :  { %1288 = vmatprep.subr.bf16.mxu0 %v2406_v5  ;;  %v2410_v8 = vld [vmem:[%s3701_s1 + $0x44] ss:$16 sps:$4 sm:$0xff]   ;;  %v2414_v10 = vld [vmem:[%s3701_s1 + $0x40] ss:$16 sps:$4 sm:$0xff]   ;;  %1277 = vmatprep.mubr.bf16.mxu1 %v2975_v48 }
   0x6   :  { %v2412_v9 = vld [vmem:[%s3701_s1 + $0x244] ss:$16 sps:$4 sm:$0xff]   ;;  %v2415_v11 = vld [vmem:[%s3701_s1 + $0x240] ss:$16 sps:$4 sm:$0xff]   ;;  %1318 = vmatprep.mubr.bf16.mxu0 %v2986_v52 }
   0x7   :  { %1248 = vmatpush1.bf16.msra.mxu1 %v2408_v6  ;;  %v2416_v12 = vld [vmem:[%s3701_s1 + $0x64] ss:$16 sps:$4 sm:$0xff]   ;;  %v2420_v14 = vld [vmem:[%s3701_s1 + $0x60] ss:$16 sps:$4 sm:$0xff]  }
   0x8   :  { %1289 = vmatpush1.bf16.msra.mxu0 %v2409_v7  ;;  %1249 = vmatprep.subr.bf16.mxu1 %v2410_v8  ;;  %v2418_v13 = vld [vmem:[%s3701_s1 + $0x264] ss:$16 sps:$4 sm:$0xff]   ;;  %v2421_v15 = vld [vmem:[%s3701_s1 + $0x260] ss:$16 sps:$4 sm:$0xff]   ;;  %v2499_v7 = vld [vmem:[%s3701_s1 + $0xc] ss:$16 sps:$4 sm:$0xff]  }
   0x9   :  { %1290 = vmatprep.subr.bf16.mxu0 %v2412_v9  ;;  %v2422_v16 = vld [vmem:[%s3701_s1 + $0x84] ss:$16 sps:$4 sm:$0xff]   ;;  %v2426_v18 = vld [vmem:[%s3701_s1 + $0x80] ss:$16 sps:$4 sm:$0xff]  }
   0xa   :  { %v2424_v17 = vld [vmem:[%s3701_s1 + $0x284] ss:$16 sps:$4 sm:$0xff]   ;;  %v2427_v19 = vld [vmem:[%s3701_s1 + $0x280] ss:$16 sps:$4 sm:$0xff]  }
   0xb   :  { %1250 = vmatpush1.bf16.msra.mxu1 %v2414_v10  ;;  %v2428_v20 = vld [vmem:[%s3701_s1 + $0xa4] ss:$16 sps:$4 sm:$0xff]   ;;  %v2432_v22 = vld [vmem:[%s3701_s1 + $0xa0] ss:$16 sps:$4 sm:$0xff]   ;;  %v2497_v10 = vld [vmem:[%s3701_s1 + $0x8] ss:$16 sps:$4 sm:$0xff]  }
   0xc   :  { %1291 = vmatpush1.bf16.msra.mxu0 %v2415_v11  ;;  %1251 = vmatprep.subr.bf16.mxu1 %v2416_v12  ;;  %v2430_v21 = vld [vmem:[%s3701_s1 + $0x2a4] ss:$16 sps:$4 sm:$0xff]   ;;  %v2433_v23 = vld [vmem:[%s3701_s1 + $0x2a0] ss:$16 sps:$4 sm:$0xff]  }
   0xd   :  { %1292 = vmatprep.subr.bf16.mxu0 %v2418_v13  ;;  %v2434_v24 = vld [vmem:[%s3701_s1 + $0xc4] ss:$16 sps:$4 sm:$0xff]   ;;  %v2438_v26 = vld [vmem:[%s3701_s1 + $0xc0] ss:$16 sps:$4 sm:$0xff]   ;;  %v2505_v13 = vld [vmem:[%s3701_s1 + $0x2c] ss:$16 sps:$4 sm:$0xff]  }
   0xe   :  { %v2436_v25 = vld [vmem:[%s3701_s1 + $0x2c4] ss:$16 sps:$4 sm:$0xff]   ;;  %v2439_v27 = vld [vmem:[%s3701_s1 + $0x2c0] ss:$16 sps:$4 sm:$0xff]  }
   0xf   :  { %1252 = vmatpush1.bf16.msra.mxu1 %v2420_v14  ;;  %v2440_v28 = vld [vmem:[%s3701_s1 + $0xe4] ss:$16 sps:$4 sm:$0xff]   ;;  %v2444_v30 = vld [vmem:[%s3701_s1 + $0xe0] ss:$16 sps:$4 sm:$0xff]  }
  0x10   :  { %1293 = vmatpush1.bf16.msra.mxu0 %v2421_v15  ;;  %1253 = vmatprep.subr.bf16.mxu1 %v2422_v16  ;;  %v2442_v29 = vld [vmem:[%s3701_s1 + $0x2e4] ss:$16 sps:$4 sm:$0xff]   ;;  %v2445_v31 = vld [vmem:[%s3701_s1 + $0x2e0] ss:$16 sps:$4 sm:$0xff]   ;;  %v2503_v15 = vld [vmem:[%s3701_s1 + $0x28] ss:$16 sps:$4 sm:$0xff]  }
  0x11   :  { %1294 = vmatprep.subr.bf16.mxu0 %v2424_v17  ;;  %v2446_v32 = vld [vmem:[%s3701_s1 + $0x104] ss:$16 sps:$4 sm:$0xff]   ;;  %v2450_v34 = vld [vmem:[%s3701_s1 + $0x100] ss:$16 sps:$4 sm:$0xff]   ;;  %v2511_v17 = vld [vmem:[%s3701_s1 + $0x4c] ss:$16 sps:$4 sm:$0xff]  }
  0x12   :  { %v2448_v33 = vld [vmem:[%s3701_s1 + $0x304] ss:$16 sps:$4 sm:$0xff]   ;;  %v2451_v35 = vld [vmem:[%s3701_s1 + $0x300] ss:$16 sps:$4 sm:$0xff]  }
  0x13   :  { %1254 = vmatpush1.bf16.msra.mxu1 %v2426_v18  ;;  %v2452_v36 = vld [vmem:[%s3701_s1 + $0x124] ss:$16 sps:$4 sm:$0xff]   ;;  %v2456_v38 = vld [vmem:[%s3701_s1 + $0x120] ss:$16 sps:$4 sm:$0xff]  }
  0x14   :  { %1295 = vmatpush1.bf16.msra.mxu0 %v2427_v19  ;;  %1255 = vmatprep.subr.bf16.mxu1 %v2428_v20  ;;  %v2454_v37 = vld [vmem:[%s3701_s1 + $0x324] ss:$16 sps:$4 sm:$0xff]   ;;  %v2457_v39 = vld [vmem:[%s3701_s1 + $0x320] ss:$16 sps:$4 sm:$0xff]   ;;  %v2509_v19 = vld [vmem:[%s3701_s1 + $0x48] ss:$16 sps:$4 sm:$0xff]  }
  0x15   :  { %1296 = vmatprep.subr.bf16.mxu0 %v2430_v21  ;;  %v2458_v40 = vld [vmem:[%s3701_s1 + $0x144] ss:$16 sps:$4 sm:$0xff]   ;;  %v2462_v42 = vld [vmem:[%s3701_s1 + $0x140] ss:$16 sps:$4 sm:$0xff]   ;;  %v2517_v21 = vld [vmem:[%s3701_s1 + $0x6c] ss:$16 sps:$4 sm:$0xff]  }
  0x16   :  { %v2460_v41 = vld [vmem:[%s3701_s1 + $0x344] ss:$16 sps:$4 sm:$0xff]   ;;  %v2463_v43 = vld [vmem:[%s3701_s1 + $0x340] ss:$16 sps:$4 sm:$0xff]  }
  0x17   :  { %1256 = vmatpush1.bf16.msra.mxu1 %v2432_v22  ;;  %v2464_v44 = vld [vmem:[%s3701_s1 + $0x164] ss:$16 sps:$4 sm:$0xff]   ;;  %v2468_v47 = vld [vmem:[%s3701_s1 + $0x160] ss:$16 sps:$4 sm:$0xff]  }
  0x18   :  { %1297 = vmatpush1.bf16.msra.mxu0 %v2433_v23  ;;  %1257 = vmatprep.subr.bf16.mxu1 %v2434_v24  ;;  %v2466_v45 = vld [vmem:[%s3701_s1 + $0x364] ss:$16 sps:$4 sm:$0xff]   ;;  %v2469_v50 = vld [vmem:[%s3701_s1 + $0x360] ss:$16 sps:$4 sm:$0xff]   ;;  %v2515_v23 = vld [vmem:[%s3701_s1 + $0x68] ss:$16 sps:$4 sm:$0xff]  }
  0x19   :  { %1298 = vmatprep.subr.bf16.mxu0 %v2436_v25  ;;  %v2470_v51 = vld [vmem:[%s3701_s1 + $0x184] ss:$16 sps:$4 sm:$0xff]   ;;  %v2474_v54 = vld [vmem:[%s3701_s1 + $0x180] ss:$16 sps:$4 sm:$0xff]   ;;  %v2523_v25 = vld [vmem:[%s3701_s1 + $0x8c] ss:$16 sps:$4 sm:$0xff]  }
  0x1a   :  { %v2472_v53 = vld [vmem:[%s3701_s1 + $0x384] ss:$16 sps:$4 sm:$0xff]   ;;  %v2475_v55 = vld [vmem:[%s3701_s1 + $0x380] ss:$16 sps:$4 sm:$0xff]  }
  0x1b   :  { %1258 = vmatpush1.bf16.msra.mxu1 %v2438_v26  ;;  %v2476_v56 = vld [vmem:[%s3701_s1 + $0x1a4] ss:$16 sps:$4 sm:$0xff]   ;;  %v2480_v58 = vld [vmem:[%s3701_s1 + $0x1a0] ss:$16 sps:$4 sm:$0xff]  }
  0x1c   :  { %1299 = vmatpush1.bf16.msra.mxu0 %v2439_v27  ;;  %1259 = vmatprep.subr.bf16.mxu1 %v2440_v28  ;;  %v2478_v57 = vld [vmem:[%s3701_s1 + $0x3a4] ss:$16 sps:$4 sm:$0xff]   ;;  %v2481_v59 = vld [vmem:[%s3701_s1 + $0x3a0] ss:$16 sps:$4 sm:$0xff]   ;;  %v2521_v27 = vld [vmem:[%s3701_s1 + $0x88] ss:$16 sps:$4 sm:$0xff]  }
  0x1d   :  { %1300 = vmatprep.subr.bf16.mxu0 %v2442_v29  ;;  %v2482_v60 = vld [vmem:[%s3701_s1 + $0x1c4] ss:$16 sps:$4 sm:$0xff]   ;;  %v2486_v62 = vld [vmem:[%s3701_s1 + $0x1c0] ss:$16 sps:$4 sm:$0xff]   ;;  %v2529_v29 = vld [vmem:[%s3701_s1 + $0xac] ss:$16 sps:$4 sm:$0xff]  }
  0x1e   :  { %v2484_v61 = vld [vmem:[%s3701_s1 + $0x3c4] ss:$16 sps:$4 sm:$0xff]   ;;  %v2487_v63 = vld [vmem:[%s3701_s1 + $0x3c0] ss:$16 sps:$4 sm:$0xff]  }
  0x1f   :  { %1260 = vmatpush1.bf16.msra.mxu1 %v2444_v30  ;;  %v2488_v0 = vld [vmem:[%s3701_s1 + $0x1e4] ss:$16 sps:$4 sm:$0xff]   ;;  %v2492_v2 = vld [vmem:[%s3701_s1 + $0x1e0] ss:$16 sps:$4 sm:$0xff]  }
  0x20   :  { %1301 = vmatpush1.bf16.msra.mxu0 %v2445_v31  ;;  %1261 = vmatprep.subr.bf16.mxu1 %v2446_v32  ;;  %v2490_v1 = vld [vmem:[%s3701_s1 + $0x3e4] ss:$16 sps:$4 sm:$0xff]   ;;  %v2493_v3 = vld [vmem:[%s3701_s1 + $0x3e0] ss:$16 sps:$4 sm:$0xff]   ;;  %v2527_v31 = vld [vmem:[%s3701_s1 + $0xa8] ss:$16 sps:$4 sm:$0xff]  }
  0x21   :  { %1302 = vmatprep.subr.bf16.mxu0 %v2448_v33  ;;  %v29_v4 = vld [vmem:[%s3702_s0] sm:$0xff]  ;;  %v31_v6 = vld [vmem:[%s3702_s0 + $0x10] sm:$0xff]  ;;  %v2535_v33 = vld [vmem:[%s3701_s1 + $0xcc] ss:$16 sps:$4 sm:$0xff]  }
  0x22   :  { %v2496_v5 = vld [vmem:[%s3701_s1 + $0x404] ss:$16 sps:$4 sm:$0xff]   ;;  %v3047_v8 = vpack.c.bf16 %v29_v4, %v29_v4  ;;  %v2494_v9 = vld [vmem:[%s3701_s1 + $0x400] ss:$16 sps:$4 sm:$0xff]   ;;  %v3055_v11 = vpack.c.bf16 %v31_v6, %v31_v6  ;;  %v2583_v4 = vld [vmem:[%s3701_s1 + $0x1cc] ss:$16 sps:$4 sm:$0xff]  }
  0x23   :  { %1262 = vmatpush1.bf16.msra.mxu1 %v2450_v34  ;;  %v2502_v12 = vld [vmem:[%s3701_s1 + $0x424] ss:$16 sps:$4 sm:$0xff]   ;;  %v2500_v14 = vld [vmem:[%s3701_s1 + $0x420] ss:$16 sps:$4 sm:$0xff]   ;;  %v34_v34 = vld [vmem:[%s3702_s0 + $0x28] sm:$0xff] }
  0x24   :  { %1303 = vmatpush1.bf16.msra.mxu0 %v2451_v35  ;;  %1263 = vmatprep.subr.bf16.mxu1 %v2452_v36  ;;  %v2508_v16 = vld [vmem:[%s3701_s1 + $0x444] ss:$16 sps:$4 sm:$0xff]   ;;  %v2506_v18 = vld [vmem:[%s3701_s1 + $0x440] ss:$16 sps:$4 sm:$0xff]   ;;  %v3129_v35 = vpack.c.bf16 %v34_v34, %v34_v34  ;;  %v2581_v6 = vld [vmem:[%s3701_s1 + $0x1c8] ss:$16 sps:$4 sm:$0xff]  }
  0x25   :  { %1304 = vmatprep.subr.bf16.mxu0 %v2454_v37  ;;  %v2514_v20 = vld [vmem:[%s3701_s1 + $0x464] ss:$16 sps:$4 sm:$0xff]   ;;  %v2512_v22 = vld [vmem:[%s3701_s1 + $0x460] ss:$16 sps:$4 sm:$0xff]   ;;  %v2533_v37 = vld [vmem:[%s3701_s1 + $0xc8] ss:$16 sps:$4 sm:$0xff]  }
  0x26   :  { %v2520_v24 = vld [vmem:[%s3701_s1 + $0x484] ss:$16 sps:$4 sm:$0xff]   ;;  %v2518_v26 = vld [vmem:[%s3701_s1 + $0x480] ss:$16 sps:$4 sm:$0xff]  }
  0x27   :  { %1264 = vmatpush1.bf16.msra.mxu1 %v2456_v38  ;;  %v2526_v28 = vld [vmem:[%s3701_s1 + $0x4a4] ss:$16 sps:$4 sm:$0xff]   ;;  %v2524_v30 = vld [vmem:[%s3701_s1 + $0x4a0] ss:$16 sps:$4 sm:$0xff]  }
  0x28   :  { %1305 = vmatpush1.bf16.msra.mxu0 %v2457_v39  ;;  %1265 = vmatprep.subr.bf16.mxu1 %v2458_v40  ;;  %v2532_v32 = vld [vmem:[%s3701_s1 + $0x4c4] ss:$16 sps:$4 sm:$0xff]   ;;  %v2530_v36 = vld [vmem:[%s3701_s1 + $0x4c0] ss:$16 sps:$4 sm:$0xff]   ;;  %v2541_v39 = vld [vmem:[%s3701_s1 + $0xec] ss:$16 sps:$4 sm:$0xff]  }
  0x29   :  { %1306 = vmatprep.subr.bf16.mxu0 %v2460_v41  ;;  %v2538_v38 = vld [vmem:[%s3701_s1 + $0x4e4] ss:$16 sps:$4 sm:$0xff]   ;;  %v2536_v40 = vld [vmem:[%s3701_s1 + $0x4e0] ss:$16 sps:$4 sm:$0xff]   ;;  %v2539_v41 = vld [vmem:[%s3701_s1 + $0xe8] ss:$16 sps:$4 sm:$0xff]  }
  0x2a   :  { %v2550_v46 = vld [vmem:[%s3701_s1 + $0x524] ss:$16 sps:$4 sm:$0xff]  }
  0x2b   :  { %1266 = vmatpush1.bf16.msra.mxu1 %v2462_v42  ;;  %v2544_v42 = vld [vmem:[%s3701_s1 + $0x504] ss:$16 sps:$4 sm:$0xff]  }
  0x2c   :  { %1307 = vmatpush1.bf16.msra.mxu0 %v2463_v43  ;;  %1267 = vmatprep.subr.bf16.mxu1 %v2464_v44  ;;  %v2547_v43 = vld [vmem:[%s3701_s1 + $0x10c] ss:$16 sps:$4 sm:$0xff]   ;;  %v2542_v44 = vld [vmem:[%s3701_s1 + $0x500] ss:$16 sps:$4 sm:$0xff]  }
  0x2d   :  { %1308 = vmatprep.subr.bf16.mxu0 %v2466_v45  ;;  %v2545_v45 = vld [vmem:[%s3701_s1 + $0x108] ss:$16 sps:$4 sm:$0xff]   ;;  %v2694_v34 = vld [vmem:[%s3703_s3 + $0x4] ss:$8 sps:$4 sm:$0xff]  }
  0x2f   :  { %1268 = vmatpush1.bf16.msra.mxu1 %v2468_v47  ;;  %v2553_v47 = vld [vmem:[%s3701_s1 + $0x12c] ss:$16 sps:$4 sm:$0xff]  }
  0x30   :  { %1309 = vmatpush1.bf16.msra.mxu0 %v2469_v50  ;;  %1269 = vmatprep.subr.bf16.mxu1 %v2470_v51  ;;  %v2556_v50 = vld [vmem:[%s3701_s1 + $0x544] ss:$16 sps:$4 sm:$0xff]   ;;  %v2559_v51 = vld [vmem:[%s3701_s1 + $0x14c] ss:$16 sps:$4 sm:$0xff]  }
  0x31   :  { %1310 = vmatprep.subr.bf16.mxu0 %v2472_v53  ;;  %v2554_v53 = vld [vmem:[%s3701_s1 + $0x540] ss:$16 sps:$4 sm:$0xff]  }
  0x33   :  { %1270 = vmatpush1.bf16.msra.mxu1 %v2474_v54  ;;  %v2557_v54 = vld [vmem:[%s3701_s1 + $0x148] ss:$16 sps:$4 sm:$0xff]  }
  0x34   :  { %1311 = vmatpush1.bf16.msra.mxu0 %v2475_v55  ;;  %1271 = vmatprep.subr.bf16.mxu1 %v2476_v56  ;;  %v2562_v55 = vld [vmem:[%s3701_s1 + $0x564] ss:$16 sps:$4 sm:$0xff]   ;;  %v2565_v56 = vld [vmem:[%s3701_s1 + $0x16c] ss:$16 sps:$4 sm:$0xff]  }
  0x35   :  { %1312 = vmatprep.subr.bf16.mxu0 %v2478_v57  ;;  %v2560_v57 = vld [vmem:[%s3701_s1 + $0x560] ss:$16 sps:$4 sm:$0xff]  }
  0x37   :  { %1272 = vmatpush1.bf16.msra.mxu1 %v2480_v58  ;;  %v2563_v58 = vld [vmem:[%s3701_s1 + $0x168] ss:$16 sps:$4 sm:$0xff]  }
  0x38   :  { %1313 = vmatpush1.bf16.msra.mxu0 %v2481_v59  ;;  %1273 = vmatprep.subr.bf16.mxu1 %v2482_v60  ;;  %v2568_v59 = vld [vmem:[%s3701_s1 + $0x584] ss:$16 sps:$4 sm:$0xff]   ;;  %v2571_v60 = vld [vmem:[%s3701_s1 + $0x18c] ss:$16 sps:$4 sm:$0xff]  }
  0x39   :  { %1314 = vmatprep.subr.bf16.mxu0 %v2484_v61  ;;  %v2566_v61 = vld [vmem:[%s3701_s1 + $0x580] ss:$16 sps:$4 sm:$0xff]  }
  0x3b   :  { %1274 = vmatpush1.bf16.msra.mxu1 %v2486_v62  ;;  %v2569_v62 = vld [vmem:[%s3701_s1 + $0x188] ss:$16 sps:$4 sm:$0xff]  }
  0x3c   :  { %1315 = vmatpush1.bf16.msra.mxu0 %v2487_v63  ;;  %1275 = vmatprep.subr.bf16.mxu1 %v2488_v0  ;;  %v2574_v63 = vld [vmem:[%s3701_s1 + $0x5a4] ss:$16 sps:$4 sm:$0xff]   ;;  %v2577_v0 = vld [vmem:[%s3701_s1 + $0x1ac] ss:$16 sps:$4 sm:$0xff]  }
  0x3d   :  { %1316 = vmatprep.subr.bf16.mxu0 %v2490_v1  ;;  %v2572_v1 = vld [vmem:[%s3701_s1 + $0x5a0] ss:$16 sps:$4 sm:$0xff]  }
  0x3f   :  { %1276 = vmatpush1.bf16.msra.mxu1 %v2492_v2  ;;  %v2575_v2 = vld [vmem:[%s3701_s1 + $0x1a8] ss:$16 sps:$4 sm:$0xff]  }
  0x40   :  { %1317 = vmatpush1.bf16.msra.mxu0 %v2493_v3  ;;  %1409 = vmatprep.subr.bf16.mxu1 %v2499_v7  ;;  %v2580_v3 = vld [vmem:[%s3701_s1 + $0x5c4] ss:$16 sps:$4 sm:$0xff]  }
  0x41   :  { %1327 = vmatprep.subr.bf16.mxu0 %v2496_v5  ;;  %v2578_v5 = vld [vmem:[%s3701_s1 + $0x5c0] ss:$16 sps:$4 sm:$0xff]   ;;  %v2586_v7 = vld [vmem:[%s3701_s1 + $0x5e4] ss:$16 sps:$4 sm:$0xff]  }
  0x42   :  { %1278 = vmatmul.mubr.bf16.vlgmr.msra.gmra.mrb[0].mxu1 %v3047_v8 }
  0x43   :  { %1319 = vmatmul.mubr.bf16.vlgmr.msra.gmra.mrb[0].mxu0 %v3055_v11  ;;  %1410 = vmatpush1.bf16.msra.mxu1 %v2497_v10  ;;  %v2584_v10 = vld [vmem:[%s3701_s1 + $0x5e0] ss:$16 sps:$4 sm:$0xff]  }
  0x44   :  { %1328 = vmatpush1.bf16.msra.mxu0 %v2494_v9  ;;  %1411 = vmatprep.subr.bf16.mxu1 %v2505_v13  ;;  %v2589_v9 = vld [vmem:[%s3701_s1 + $0x1ec] ss:$16 sps:$4 sm:$0xff]   ;;  %v33_v13 = vld [vmem:[%s3702_s0 + $0x20] sm:$0xff] }
  0x45   :  { %1329 = vmatprep.subr.bf16.mxu0 %v2502_v12  ;;  %1441 = vmatprep.mubr.bf16.mxu1 %v2975_v48  ;;  %v2548_v48 = vld [vmem:[%s3701_s1 + $0x520] ss:$16 sps:$4 sm:$0xff]   ;;  %v2587_v12 = vld [vmem:[%s3701_s1 + $0x1e8] ss:$16 sps:$4 sm:$0xff]  }
  0x46   :  { %1359 = vmatprep.mubr.bf16.mxu0 %v3129_v35 }
  0x47   :  { %1412 = vmatpush1.bf16.msra.mxu1 %v2503_v15  ;;  %v2598_v15 = vld [vmem:[%s3701_s1 + $0x604] ss:$16 sps:$4 sm:$0xff]  }
  0x48   :  { %1330 = vmatpush1.bf16.msra.mxu0 %v2500_v14  ;;  %1413 = vmatprep.subr.bf16.mxu1 %v2511_v17  ;;  %v2592_v14 = vld [vmem:[%s3701_s1 + $0x20c] ss:$16 sps:$4 sm:$0xff]   ;;  %v2590_v17 = vld [vmem:[%s3701_s1 + $0x208] ss:$16 sps:$4 sm:$0xff]  }
  0x49   :  { %1331 = vmatprep.subr.bf16.mxu0 %v2508_v16  ;;  %v3255_v16 = vpack.c.bf16 %v33_v13, %v33_v13  ;;  %v2646_v13 = vld [vmem:[%s3701_s1 + $0x42c] ss:$16 sps:$4 sm:$0xff]  }
  0x4b   :  { %1414 = vmatpush1.bf16.msra.mxu1 %v2509_v19  ;;  %v2595_v19 = vld [vmem:[%s3701_s1 + $0x22c] ss:$16 sps:$4 sm:$0xff]  }
  0x4c   :  { %1332 = vmatpush1.bf16.msra.mxu0 %v2506_v18  ;;  %1415 = vmatprep.subr.bf16.mxu1 %v2517_v21  ;;  %v2596_v18 = vld [vmem:[%s3701_s1 + $0x600] ss:$16 sps:$4 sm:$0xff]   ;;  %v2601_v21 = vld [vmem:[%s3701_s1 + $0x24c] ss:$16 sps:$4 sm:$0xff]  }
  0x4d   :  { %1333 = vmatprep.subr.bf16.mxu0 %v2514_v20  ;;  %v2593_v20 = vld [vmem:[%s3701_s1 + $0x228] ss:$16 sps:$4 sm:$0xff]  }
  0x4f   :  { %1416 = vmatpush1.bf16.msra.mxu1 %v2515_v23  ;;  %v35_v23 = vld [vmem:[%s3702_s0 + $0x30] sm:$0xff] }
  0x50   :  { %1334 = vmatpush1.bf16.msra.mxu0 %v2512_v22  ;;  %1417 = vmatprep.subr.bf16.mxu1 %v2523_v25  ;;  %v2790_v22 = vmov 0   ;;  %v3285_v25 = vpack.c.bf16 %v35_v23, %v35_v23  ;;  %v2650_v23 = vld [vmem:[%s3701_s1 + $0x468] ss:$16 sps:$4 sm:$0xff]  }
  0x51   :  { %1335 = vmatprep.subr.bf16.mxu0 %v2520_v24  ;;  %v2604_v24 = vld [vmem:[%s3701_s1 + $0x26c] ss:$16 sps:$4 sm:$0xff]  }
  0x53   :  { %1418 = vmatpush1.bf16.msra.mxu1 %v2521_v27  ;;  %v2605_v27 = vld [vmem:[%s3701_s1 + $0x288] ss:$16 sps:$4 sm:$0xff]  }
  0x54   :  { %1336 = vmatpush1.bf16.msra.mxu0 %v2518_v26  ;;  %1419 = vmatprep.subr.bf16.mxu1 %v2529_v29  ;;  %v2607_v26 = vld [vmem:[%s3701_s1 + $0x28c] ss:$16 sps:$4 sm:$0xff]   ;;  %v2608_v29 = vld [vmem:[%s3701_s1 + $0x2a8] ss:$16 sps:$4 sm:$0xff]  }
  0x55   :  { %1337 = vmatprep.subr.bf16.mxu0 %v2526_v28  ;;  %v2610_v28 = vld [vmem:[%s3701_s1 + $0x2ac] ss:$16 sps:$4 sm:$0xff]  }
  0x57   :  { %1420 = vmatpush1.bf16.msra.mxu1 %v2527_v31  ;;  %v2611_v31 = vld [vmem:[%s3701_s1 + $0x2c8] ss:$16 sps:$4 sm:$0xff]  }
  0x58   :  { %1338 = vmatpush1.bf16.msra.mxu0 %v2524_v30  ;;  %1421 = vmatprep.subr.bf16.mxu1 %v2535_v33  ;;  %v2613_v30 = vld [vmem:[%s3701_s1 + $0x2cc] ss:$16 sps:$4 sm:$0xff]   ;;  %v2692_v33 = vld [vmem:[%s3703_s3] ss:$8 sps:$4 sm:$0xff]  }
  0x59   :  { %1339 = vmatprep.subr.bf16.mxu0 %v2532_v32  ;;  %v2616_v32 = vld [vmem:[%s3701_s1 + $0x2ec] ss:$16 sps:$4 sm:$0xff]  }
  0x5b   :  { %1422 = vmatpush1.bf16.msra.mxu1 %v2533_v37  ;;  %v2697_v37 = vld [vmem:[%s3703_s3 + $0x14] ss:$8 sps:$4 sm:$0xff]  }
  0x5c   :  { %1340 = vmatpush1.bf16.msra.mxu0 %v2530_v36  ;;  %1423 = vmatprep.subr.bf16.mxu1 %v2541_v39  ;;  %v2614_v36 = vld [vmem:[%s3701_s1 + $0x2e8] ss:$16 sps:$4 sm:$0xff]  }
  0x5d   :  { %1341 = vmatprep.subr.bf16.mxu0 %v2538_v38  ;;  %v2619_v38 = vld [vmem:[%s3701_s1 + $0x30c] ss:$16 sps:$4 sm:$0xff]   ;;  %v2695_v39 = vld [vmem:[%s3703_s3 + $0x10] ss:$8 sps:$4 sm:$0xff]  }
  0x5f   :  { %1424 = vmatpush1.bf16.msra.mxu1 %v2539_v41  ;;  %v2617_v41 = vld [vmem:[%s3701_s1 + $0x308] ss:$16 sps:$4 sm:$0xff]  }
  0x60   :  { %1342 = vmatpush1.bf16.msra.mxu0 %v2536_v40  ;;  %1425 = vmatprep.subr.bf16.mxu1 %v2547_v43  ;;  %v2700_v40 = vld [vmem:[%s3703_s3 + $0x24] ss:$8 sps:$4 sm:$0xff]   ;;  %v2698_v43 = vld [vmem:[%s3703_s3 + $0x20] ss:$8 sps:$4 sm:$0xff]  }
  0x61   :  { %1343 = vmatprep.subr.bf16.mxu0 %v2544_v42  ;;  %v2622_v42 = vld [vmem:[%s3701_s1 + $0x32c] ss:$16 sps:$4 sm:$0xff]  }
  0x63   :  { %1426 = vmatpush1.bf16.msra.mxu1 %v2545_v45  ;;  %v2620_v45 = vld [vmem:[%s3701_s1 + $0x328] ss:$16 sps:$4 sm:$0xff]  }
  0x64   :  { %1344 = vmatpush1.bf16.msra.mxu0 %v2542_v44  ;;  %1427 = vmatprep.subr.bf16.mxu1 %v2553_v47  ;;  %v2703_v44 = vld [vmem:[%s3703_s3 + $0x34] ss:$8 sps:$4 sm:$0xff]   ;;  %v2701_v47 = vld [vmem:[%s3703_s3 + $0x30] ss:$8 sps:$4 sm:$0xff]  }
  0x65   :  { %1345 = vmatprep.subr.bf16.mxu0 %v2550_v46  ;;  %v2625_v46 = vld [vmem:[%s3701_s1 + $0x34c] ss:$16 sps:$4 sm:$0xff]  }
  0x67   :  { %1428 = vmatpush1.bf16.msra.mxu1 %v2551_v49  ;;  %v2623_v49 = vld [vmem:[%s3701_s1 + $0x348] ss:$16 sps:$4 sm:$0xff]  }
  0x68   :  { %1346 = vmatpush1.bf16.msra.mxu0 %v2548_v48  ;;  %1429 = vmatprep.subr.bf16.mxu1 %v2559_v51  ;;  %v2706_v48 = vld [vmem:[%s3703_s3 + $0x44] ss:$8 sps:$4 sm:$0xff]   ;;  %v2626_v51 = vld [vmem:[%s3701_s1 + $0x368] ss:$16 sps:$4 sm:$0xff]  }
  0x69   :  { %1347 = vmatprep.subr.bf16.mxu0 %v2556_v50  ;;  %v2628_v50 = vld [vmem:[%s3701_s1 + $0x36c] ss:$16 sps:$4 sm:$0xff]  }
  0x6b   :  { %1430 = vmatpush1.bf16.msra.mxu1 %v2557_v54  ;;  %v2709_v54 = vld [vmem:[%s3703_s3 + $0x54] ss:$8 sps:$4 sm:$0xff]  }
  0x6c   :  { %1348 = vmatpush1.bf16.msra.mxu0 %v2554_v53  ;;  %1431 = vmatprep.subr.bf16.mxu1 %v2565_v56  ;;  %v2704_v53 = vld [vmem:[%s3703_s3 + $0x40] ss:$8 sps:$4 sm:$0xff]   ;;  %v2707_v56 = vld [vmem:[%s3703_s3 + $0x50] ss:$8 sps:$4 sm:$0xff]  }
  0x6d   :  { %1349 = vmatprep.subr.bf16.mxu0 %v2562_v55  ;;  %v2631_v55 = vld [vmem:[%s3701_s1 + $0x38c] ss:$16 sps:$4 sm:$0xff]  }
  0x6f   :  { %1432 = vmatpush1.bf16.msra.mxu1 %v2563_v58  ;;  %v2629_v58 = vld [vmem:[%s3701_s1 + $0x388] ss:$16 sps:$4 sm:$0xff]  }
  0x70   :  { %1350 = vmatpush1.bf16.msra.mxu0 %v2560_v57  ;;  %1433 = vmatprep.subr.bf16.mxu1 %v2571_v60  ;;  %v2712_v57 = vld [vmem:[%s3703_s3 + $0x64] ss:$8 sps:$4 sm:$0xff]   ;;  %v2710_v60 = vld [vmem:[%s3703_s3 + $0x60] ss:$8 sps:$4 sm:$0xff]  }
  0x71   :  { %1351 = vmatprep.subr.bf16.mxu0 %v2568_v59  ;;  %v2634_v59 = vld [vmem:[%s3701_s1 + $0x3ac] ss:$16 sps:$4 sm:$0xff]  }
  0x73   :  { %1434 = vmatpush1.bf16.msra.mxu1 %v2569_v62  ;;  %v2632_v62 = vld [vmem:[%s3701_s1 + $0x3a8] ss:$16 sps:$4 sm:$0xff]  }
  0x74   :  { %1352 = vmatpush1.bf16.msra.mxu0 %v2566_v61  ;;  %1435 = vmatprep.subr.bf16.mxu1 %v2577_v0  ;;  %v2715_v61 = vld [vmem:[%s3703_s3 + $0x74] ss:$8 sps:$4 sm:$0xff]   ;;  %v2713_v0 = vld [vmem:[%s3703_s3 + $0x70] ss:$8 sps:$4 sm:$0xff]  }
  0x75   :  { %1353 = vmatprep.subr.bf16.mxu0 %v2574_v63  ;;  %v2637_v63 = vld [vmem:[%s3701_s1 + $0x3cc] ss:$16 sps:$4 sm:$0xff]  }
  0x77   :  { %1436 = vmatpush1.bf16.msra.mxu1 %v2575_v2  ;;  %v2635_v2 = vld [vmem:[%s3701_s1 + $0x3c8] ss:$16 sps:$4 sm:$0xff]  }
  0x78   :  { %1354 = vmatpush1.bf16.msra.mxu0 %v2572_v1  ;;  %1437 = vmatprep.subr.bf16.mxu1 %v2583_v4  ;;  %v2718_v1 = vld [vmem:[%s3703_s3 + $0x84] ss:$8 sps:$4 sm:$0xff]   ;;  %v2716_v4 = vld [vmem:[%s3703_s3 + $0x80] ss:$8 sps:$4 sm:$0xff]  }
  0x79   :  { %1355 = vmatprep.subr.bf16.mxu0 %v2580_v3  ;;  %v2640_v3 = vld [vmem:[%s3701_s1 + $0x3ec] ss:$16 sps:$4 sm:$0xff]  }
  0x7b   :  { %1438 = vmatpush1.bf16.msra.mxu1 %v2581_v6  ;;  %v2638_v6 = vld [vmem:[%s3701_s1 + $0x3e8] ss:$16 sps:$4 sm:$0xff]  }
  0x7c   :  { %1356 = vmatpush1.bf16.msra.mxu0 %v2578_v5  ;;  %1439 = vmatprep.subr.bf16.mxu1 %v2589_v9  ;;  %v2721_v5 = vld [vmem:[%s3703_s3 + $0x94] ss:$8 sps:$4 sm:$0xff]   ;;  %v2719_v9 = vld [vmem:[%s3703_s3 + $0x90] ss:$8 sps:$4 sm:$0xff]  }
  0x7d   :  { %1357 = vmatprep.subr.bf16.mxu0 %v2586_v7  ;;  %v2643_v7 = vld [vmem:[%s3701_s1 + $0x40c] ss:$16 sps:$4 sm:$0xff]  }
  0x7f   :  { %1440 = vmatpush1.bf16.msra.mxu1 %v2587_v12  ;;  %v2641_v12 = vld [vmem:[%s3701_s1 + $0x408] ss:$16 sps:$4 sm:$0xff]  }
  0x80   :  { %1358 = vmatpush1.bf16.msra.mxu0 %v2584_v10  ;;  %1450 = vmatprep.subr.bf16.mxu1 %v2592_v14  ;;  %v2724_v10 = vld [vmem:[%s3703_s3 + $0xa4] ss:$8 sps:$4 sm:$0xff]   ;;  %v2722_v14 = vld [vmem:[%s3703_s3 + $0xa0] ss:$8 sps:$4 sm:$0xff]  }
  0x81   :  { %1368 = vmatprep.subr.bf16.mxu0 %v2598_v15  ;;  %v2727_v15 = vld [vmem:[%s3703_s3 + $0xb4] ss:$8 sps:$4 sm:$0xff]  }
  0x82   :  { %1442 = vmatmul.mubr.bf16.vlgmr.msra.gmra.mrb[4].mxu1 %v3047_v8  ;;  %v2599_v8 = vld [vmem:[%s3701_s1 + $0x248] ss:$16 sps:$4 sm:$0xff]  }
  0x83   :  { %1360 = vmatmul.mubr.bf16.vlgmr.msra.gmra.mrb[0].mxu0 %v3255_v16  ;;  %1451 = vmatpush1.bf16.msra.mxu1 %v2590_v17  ;;  %v2644_v17 = vld [vmem:[%s3701_s1 + $0x428] ss:$16 sps:$4 sm:$0xff]  }
  0x84   :  { %1369 = vmatpush1.bf16.msra.mxu0 %v2596_v18  ;;  %1452 = vmatprep.subr.bf16.mxu1 %v2595_v19  ;;  %v2649_v18 = vld [vmem:[%s3701_s1 + $0x44c] ss:$16 sps:$4 sm:$0xff]  }
  0x85   :  { %1400 = vmatprep.mubr.bf16.mxu0 %v2790_v22  ;;  %1482 = vmatprep.mubr.bf16.mxu1 %v2986_v52  ;;  %v2602_v52 = vld [vmem:[%s3701_s1 + $0x268] ss:$16 sps:$4 sm:$0xff]   ;;  %v2730_v19 = vld [vmem:[%s3703_s3 + $0xc4] ss:$8 sps:$4 sm:$0xff]  }
  0x86   :  { %1981 = vmatprep.subr.bf16.mxu0 %v2694_v34  ;;  %v2665_v34 = vld [vmem:[%s3701_s1 + $0x508] ss:$16 sps:$4 sm:$0xff]  }
  0x87   :  { %1453 = vmatpush1.bf16.msra.mxu1 %v2593_v20  ;;  %v2652_v20 = vld [vmem:[%s3701_s1 + $0x46c] ss:$16 sps:$4 sm:$0xff]  }
  0x88   :  { %1454 = vmatprep.subr.bf16.mxu1 %v2601_v21  ;;  %v2728_v21 = vld [vmem:[%s3703_s3 + $0xc0] ss:$8 sps:$4 sm:$0xff]  }
  0x8b   :  { %1455 = vmatpush1.bf16.msra.mxu1 %v2599_v8  ;;  %v2733_v8 = vld [vmem:[%s3703_s3 + $0xd4] ss:$8 sps:$4 sm:$0xff]  }
  0x8c   :  { %1456 = vmatprep.subr.bf16.mxu1 %v2604_v24  ;;  %v2655_v24 = vld [vmem:[%s3701_s1 + $0x48c] ss:$16 sps:$4 sm:$0xff]  }
  0x8f   :  { %2298 = vmatmul.mubr.msk.bf16.vlgmr.msra.gmra.mrb[0].mxu0 %vm1241_vm0, %v3285_v25  ;;  %1457 = vmatpush1.bf16.msra.mxu1 %v2602_v52  ;;  %v2731_v52 = vld [vmem:[%s3703_s3 + $0xd0] ss:$8 sps:$4 sm:$0xff]  }
  0x90   :  { %1458 = vmatprep.subr.bf16.mxu1 %v2607_v26  ;;  %1982 = vmatpush1.bf16.msra.mxu0 %v2692_v33  ;;  %v2653_v26 = vld [vmem:[%s3701_s1 + $0x488] ss:$16 sps:$4 sm:$0xff]   ;;  %v2667_v33 = vld [vmem:[%s3701_s1 + $0x50c] ss:$16 sps:$4 sm:$0xff]  }
  0x91   :  { %1983 = vmatprep.subr.bf16.mxu0 %v2697_v37  ;;  %v2736_v37 = vld [vmem:[%s3703_s3 + $0xe4] ss:$8 sps:$4 sm:$0xff]  }
  0x93   :  { %1459 = vmatpush1.bf16.msra.mxu1 %v2605_v27  ;;  %v2658_v27 = vld [vmem:[%s3701_s1 + $0x4ac] ss:$16 sps:$4 sm:$0xff]  }
  0x94   :  { %1460 = vmatprep.subr.bf16.mxu1 %v2610_v28  ;;  %1984 = vmatpush1.bf16.msra.mxu0 %v2695_v39  ;;  %v2656_v28 = vld [vmem:[%s3701_s1 + $0x4a8] ss:$16 sps:$4 sm:$0xff]  }
  0x95   :  { %1985 = vmatprep.subr.bf16.mxu0 %v2700_v40  ;;  %v2734_v39 = vld [vmem:[%s3703_s3 + $0xe0] ss:$8 sps:$4 sm:$0xff]   ;;  %v2673_v40 = vld [vmem:[%s3701_s1 + $0x54c] ss:$16 sps:$4 sm:$0xff]  }
  0x97   :  { %1461 = vmatpush1.bf16.msra.mxu1 %v2608_v29  ;;  %v2661_v29 = vld [vmem:[%s3701_s1 + $0x4cc] ss:$16 sps:$4 sm:$0xff]  }
  0x98   :  { %1462 = vmatprep.subr.bf16.mxu1 %v2613_v30  ;;  %1986 = vmatpush1.bf16.msra.mxu0 %v2698_v43  ;;  %v2659_v30 = vld [vmem:[%s3701_s1 + $0x4c8] ss:$16 sps:$4 sm:$0xff]  }
  0x99   :  { %1987 = vmatprep.subr.bf16.mxu0 %v2703_v44  ;;  %v2737_v43 = vld [vmem:[%s3703_s3 + $0xf0] ss:$8 sps:$4 sm:$0xff]   ;;  %v2676_v44 = vld [vmem:[%s3701_s1 + $0x56c] ss:$16 sps:$4 sm:$0xff]  }
  0x9b   :  { %1463 = vmatpush1.bf16.msra.mxu1 %v2611_v31  ;;  %v2664_v31 = vld [vmem:[%s3701_s1 + $0x4ec] ss:$16 sps:$4 sm:$0xff]  }
  0x9c   :  { %1464 = vmatprep.subr.bf16.mxu1 %v2616_v32  ;;  %1988 = vmatpush1.bf16.msra.mxu0 %v2701_v47  ;;  %v2662_v32 = vld [vmem:[%s3701_s1 + $0x4e8] ss:$16 sps:$4 sm:$0xff]   ;;  %v2742_v47 = vld [vmem:[%s3703_s3 + $0x104] ss:$8 sps:$4 sm:$0xff]  }
  0x9d   :  { %1989 = vmatprep.subr.bf16.mxu0 %v2706_v48  ;;  %v2677_v48 = vld [vmem:[%s3701_s1 + $0x588] ss:$16 sps:$4 sm:$0xff]  }
  0x9f   :  { %1465 = vmatpush1.bf16.msra.mxu1 %v2614_v36  ;;  %v2670_v36 = vld [vmem:[%s3701_s1 + $0x52c] ss:$16 sps:$4 sm:$0xff]  }
  0xa0   :  { %1466 = vmatprep.subr.bf16.mxu1 %v2619_v38  ;;  %1990 = vmatpush1.bf16.msra.mxu0 %v2704_v53  ;;  %v2668_v38 = vld [vmem:[%s3701_s1 + $0x528] ss:$16 sps:$4 sm:$0xff]  }
  0xa1   :  { %1991 = vmatprep.subr.bf16.mxu0 %v2709_v54  ;;  %v2683_v53 = vld [vmem:[%s3701_s1 + $0x5c8] ss:$16 sps:$4 sm:$0xff]   ;;  %v2688_v54 = vld [vmem:[%s3701_s1 + $0x5ec] ss:$16 sps:$4 sm:$0xff]  }
  0xa3   :  { %1467 = vmatpush1.bf16.msra.mxu1 %v2617_v41  ;;  %v2739_v41 = vld [vmem:[%s3703_s3 + $0xf4] ss:$8 sps:$4 sm:$0xff]  }
  0xa4   :  { %1468 = vmatprep.subr.bf16.mxu1 %v2622_v42  ;;  %1992 = vmatpush1.bf16.msra.mxu0 %v2707_v56  ;;  %v2671_v42 = vld [vmem:[%s3701_s1 + $0x548] ss:$16 sps:$4 sm:$0xff]   ;;  %v2691_v56 = vld [vmem:[%s3701_s1 + $0x60c] ss:$16 sps:$4 sm:$0xff]  }
  0xa5   :  { %1993 = vmatprep.subr.bf16.mxu0 %v2712_v57  ;;  %v2689_v57 = vld [vmem:[%s3701_s1 + $0x608] ss:$16 sps:$4 sm:$0xff]  }
  0xa7   :  { %1469 = vmatpush1.bf16.msra.mxu1 %v2620_v45  ;;  %v2674_v45 = vld [vmem:[%s3701_s1 + $0x568] ss:$16 sps:$4 sm:$0xff]  }
  0xa8   :  { %1470 = vmatprep.subr.bf16.mxu1 %v2625_v46  ;;  %1994 = vmatpush1.bf16.msra.mxu0 %v2710_v60  ;;  %v2679_v46 = vld [vmem:[%s3701_s1 + $0x58c] ss:$16 sps:$4 sm:$0xff]  }
  0xa9   :  { %1995 = vmatprep.subr.bf16.mxu0 %v2715_v61 }
  0xab   :  { %1471 = vmatpush1.bf16.msra.mxu1 %v2623_v49  ;;  %v2682_v49 = vld [vmem:[%s3701_s1 + $0x5ac] ss:$16 sps:$4 sm:$0xff]  }
  0xac   :  { %1472 = vmatprep.subr.bf16.mxu1 %v2628_v50  ;;  %1996 = vmatpush1.bf16.msra.mxu0 %v2713_v0  ;;  %v2680_v50 = vld [vmem:[%s3701_s1 + $0x5a8] ss:$16 sps:$4 sm:$0xff]  }
  0xad   :  { %1997 = vmatprep.subr.bf16.mxu0 %v2718_v1 }
  0xaf   :  { %1473 = vmatpush1.bf16.msra.mxu1 %v2626_v51  ;;  %v2685_v51 = vld [vmem:[%s3701_s1 + $0x5cc] ss:$16 sps:$4 sm:$0xff]  }
  0xb0   :  { %1474 = vmatprep.subr.bf16.mxu1 %v2631_v55  ;;  %1998 = vmatpush1.bf16.msra.mxu0 %v2716_v4  ;;  %v2686_v55 = vld [vmem:[%s3701_s1 + $0x5e8] ss:$16 sps:$4 sm:$0xff]  }
  0xb1   :  { %1999 = vmatprep.subr.bf16.mxu0 %v2721_v5 }
  0xb3   :  { %1475 = vmatpush1.bf16.msra.mxu1 %v2629_v58 }
  0xb4   :  { %1476 = vmatprep.subr.bf16.mxu1 %v2634_v59  ;;  %2000 = vmatpush1.bf16.msra.mxu0 %v2719_v9 }
  0xb5   :  { %2001 = vmatprep.subr.bf16.mxu0 %v2724_v10 }
  0xb7   :  { %1477 = vmatpush1.bf16.msra.mxu1 %v2632_v62  ;;  %v241_v62 = vlaneseq }
  0xb8   :  { %1478 = vmatprep.subr.bf16.mxu1 %v2637_v63  ;;  %2002 = vmatpush1.bf16.msra.mxu0 %v2722_v14 }
  0xb9   :  { %2003 = vmatprep.subr.bf16.mxu0 %v2727_v15  ;;  %v3571_v63 = vshrl.u32 %v241_v62, 7 }
  0xbb   :  { %1479 = vmatpush1.bf16.msra.mxu1 %v2635_v2  ;;  %v3574_v0 = vsub.s32 0, %v3571_v63 }
  0xbc   :  { %1480 = vmatprep.subr.bf16.mxu1 %v2640_v3 }
  0xbf   :  { %1481 = vmatpush1.bf16.msra.mxu1 %v2638_v6 }
  0xc0   :  { %1491 = vmatprep.subr.bf16.mxu1 %v2643_v7 }
  0xc2   :  { %1483 = vmatmul.mubr.bf16.vlgmr.msra.gmra.mrb[4].mxu1 %v3055_v11  ;;  %v2725_v11 = vld [vmem:[%s3703_s3 + $0xb0] ss:$8 sps:$4 sm:$0xff]  }
  0xc3   :  { %1492 = vmatpush1.bf16.msra.mxu1 %v2641_v12  ;;  %1523 = vmatprep.mubr.bf16.mxu1 %v3129_v35  ;;  %v2647_v35 = vld [vmem:[%s3701_s1 + $0x448] ss:$16 sps:$4 sm:$0xff]  }
  0xc4   :  { %1493 = vmatprep.subr.bf16.mxu1 %v2646_v13  ;;  %2004 = vmatpush1.bf16.msra.mxu0 %v2725_v11 }
  0xc5   :  { %2005 = vmatprep.subr.bf16.mxu0 %v2730_v19  ;;  %v2745_v19 = vld [vmem:[%s3703_s3 + $0x114] ss:$8 sps:$4 sm:$0xff]  }
  0xc7   :  { %1494 = vmatpush1.bf16.msra.mxu1 %v2644_v17 }
  0xc8   :  { %1495 = vmatprep.subr.bf16.mxu1 %v2649_v18  ;;  %2006 = vmatpush1.bf16.msra.mxu0 %v2728_v21  ;;  %v2740_v18 = vld [vmem:[%s3703_s3 + $0x100] ss:$8 sps:$4 sm:$0xff]  }
  0xc9   :  { %2007 = vmatprep.subr.bf16.mxu0 %v2733_v8  ;;  %v2746_v21 = vld [vmem:[%s3703_s3 + $0x120] ss:$8 sps:$4 sm:$0xff]   ;;  %v2751_v8 = vld [vmem:[%s3703_s3 + $0x134] ss:$8 sps:$4 sm:$0xff]  }
  0xcb   :  { %1496 = vmatpush1.bf16.msra.mxu1 %v2647_v35  ;;  %v2743_v35 = vld [vmem:[%s3703_s3 + $0x110] ss:$8 sps:$4 sm:$0xff]  }
  0xcc   :  { %1497 = vmatprep.subr.bf16.mxu1 %v2652_v20  ;;  %2008 = vmatpush1.bf16.msra.mxu0 %v2731_v52  ;;  %v2748_v20 = vld [vmem:[%s3703_s3 + $0x124] ss:$8 sps:$4 sm:$0xff]   ;;  %v2752_v52 = vld [vmem:[%s3703_s3 + $0x140] ss:$8 sps:$4 sm:$0xff]  }
  0xcd   :  { %2009 = vmatprep.subr.bf16.mxu0 %v2736_v37  ;;  %v2772_v37 = vld [vmem:[%s3703_s3 + $0x1a4] ss:$8 sps:$4 sm:$0xff]  }
  0xcf   :  { %1498 = vmatpush1.bf16.msra.mxu1 %v2650_v23  ;;  %v2749_v23 = vld [vmem:[%s3703_s3 + $0x130] ss:$8 sps:$4 sm:$0xff]  }
  0xd0   :  { %1499 = vmatprep.subr.bf16.mxu1 %v2655_v24  ;;  %2010 = vmatpush1.bf16.msra.mxu0 %v2734_v39  ;;  %v2754_v24 = vld [vmem:[%s3703_s3 + $0x144] ss:$8 sps:$4 sm:$0xff]   ;;  %v2775_v39 = vld [vmem:[%s3703_s3 + $0x1b4] ss:$8 sps:$4 sm:$0xff]  }
  0xd1   :  { %2011 = vmatprep.subr.bf16.mxu0 %v2739_v41  ;;  %v2778_v41 = vld [vmem:[%s3703_s3 + $0x1c4] ss:$8 sps:$4 sm:$0xff]  }
  0xd3   :  { %1500 = vmatpush1.bf16.msra.mxu1 %v2653_v26  ;;  %v2757_v26 = vld [vmem:[%s3703_s3 + $0x154] ss:$8 sps:$4 sm:$0xff]  }
  0xd4   :  { %1501 = vmatprep.subr.bf16.mxu1 %v2658_v27  ;;  %2012 = vmatpush1.bf16.msra.mxu0 %v2737_v43  ;;  %v2755_v27 = vld [vmem:[%s3703_s3 + $0x150] ss:$8 sps:$4 sm:$0xff]   ;;  %v2781_v43 = vld [vmem:[%s3703_s3 + $0x1d4] ss:$8 sps:$4 sm:$0xff]  }
  0xd5   :  { %2022 = vmatprep.subr.bf16.mxu0 %v2742_v47  ;;  %v2787_v47 = vld [vmem:[%s3703_s3 + $0x1f4] ss:$8 sps:$4 sm:$0xff]  }
  0xd7   :  { %1502 = vmatpush1.bf16.msra.mxu1 %v2656_v28  ;;  %v2760_v28 = vld [vmem:[%s3703_s3 + $0x164] ss:$8 sps:$4 sm:$0xff]  }
  0xd8   :  { %1503 = vmatprep.subr.bf16.mxu1 %v2661_v29  ;;  %v2758_v29 = vld [vmem:[%s3703_s3 + $0x160] ss:$8 sps:$4 sm:$0xff]  }
  0xdb   :  { %1504 = vmatpush1.bf16.msra.mxu1 %v2659_v30  ;;  %v2763_v30 = vld [vmem:[%s3703_s3 + $0x174] ss:$8 sps:$4 sm:$0xff]  }
  0xdc   :  { %1505 = vmatprep.subr.bf16.mxu1 %v2664_v31  ;;  %v2761_v31 = vld [vmem:[%s3703_s3 + $0x170] ss:$8 sps:$4 sm:$0xff]  }
  0xdf   :  { %1506 = vmatpush1.bf16.msra.mxu1 %v2662_v32  ;;  %v2766_v32 = vld [vmem:[%s3703_s3 + $0x184] ss:$8 sps:$4 sm:$0xff]  }
  0xe0   :  { %1507 = vmatprep.subr.bf16.mxu1 %v2667_v33  ;;  %v2764_v33 = vld [vmem:[%s3703_s3 + $0x180] ss:$8 sps:$4 sm:$0xff]  }
  0xe3   :  { %1508 = vmatpush1.bf16.msra.mxu1 %v2665_v34  ;;  %v2769_v34 = vld [vmem:[%s3703_s3 + $0x194] ss:$8 sps:$4 sm:$0xff]  }
  0xe4   :  { %1509 = vmatprep.subr.bf16.mxu1 %v2670_v36  ;;  %v2767_v36 = vld [vmem:[%s3703_s3 + $0x190] ss:$8 sps:$4 sm:$0xff]  }
  0xe7   :  { %1510 = vmatpush1.bf16.msra.mxu1 %v2668_v38  ;;  %v2770_v38 = vld [vmem:[%s3703_s3 + $0x1a0] ss:$8 sps:$4 sm:$0xff]  }
  0xe8   :  { %1511 = vmatprep.subr.bf16.mxu1 %v2673_v40  ;;  %v2773_v40 = vld [vmem:[%s3703_s3 + $0x1b0] ss:$8 sps:$4 sm:$0xff]  }
  0xeb   :  { %1512 = vmatpush1.bf16.msra.mxu1 %v2671_v42  ;;  %v2776_v42 = vld [vmem:[%s3703_s3 + $0x1c0] ss:$8 sps:$4 sm:$0xff]  }
  0xec   :  { %1513 = vmatprep.subr.bf16.mxu1 %v2676_v44  ;;  %v2779_v44 = vld [vmem:[%s3703_s3 + $0x1d0] ss:$8 sps:$4 sm:$0xff]  }
  0xef   :  { %1514 = vmatpush1.bf16.msra.mxu1 %v2674_v45  ;;  %v2784_v45 = vld [vmem:[%s3703_s3 + $0x1e4] ss:$8 sps:$4 sm:$0xff]  }
  0xf0   :  { %1515 = vmatprep.subr.bf16.mxu1 %v2679_v46  ;;  %v2782_v46 = vld [vmem:[%s3703_s3 + $0x1e0] ss:$8 sps:$4 sm:$0xff]  }
  0xf3   :  { %1516 = vmatpush1.bf16.msra.mxu1 %v2677_v48  ;;  %v2785_v48 = vld [vmem:[%s3703_s3 + $0x1f0] ss:$8 sps:$4 sm:$0xff]  }
  0xf4   :  { %1517 = vmatprep.subr.bf16.mxu1 %v2682_v49  ;;  %v251_v49 = vsub.s32 2, %v3571_v63 }
  0xf7   :  { %1518 = vmatpush1.bf16.msra.mxu1 %v2680_v50  ;;  %v255_v50 = vsub.s32 3, %v3571_v63 }
  0xf8   :  { %1519 = vmatprep.subr.bf16.mxu1 %v2685_v51 }
  0xfb   :  { %1520 = vmatpush1.bf16.msra.mxu1 %v2683_v53 }
  0xfc   :  { %1521 = vmatprep.subr.bf16.mxu1 %v2688_v54 }
  0xff   :  { %1522 = vmatpush1.bf16.msra.mxu1 %v2686_v55 }
 0x100   :  { %1532 = vmatprep.subr.bf16.mxu1 %v2691_v56 }
 0x102   :  { %1524 = vmatmul.mubr.bf16.vlgmr.msra.gmra.mrb[4].mxu1 %v3255_v16  ;;  %v3579_v16 = vld [vmem:[%s3704_s2] sm:$0xf] }
 0x103   :  { %1533 = vmatpush1.bf16.msra.mxu1 %v2689_v57  ;;  %1564 = vmatprep.mubr.bf16.mxu1 %v2790_v22  ;;  %v3582_v22 = vsub.s32 1, %v3571_v63  ;;  %v252_v51 = vrot.slane %v3579_v16, %v251_v49  ;;  %v256_v53 = vrot.slane %v3579_v16, %v255_v50  ;;  %v12_v63 = vstv %s3705_s6 }
 0x104   :  { %13 = vst [vmem:[#allocation2] sm:$0x1] %v12_v63 }
 0x105   :  { %v248_v1 = vrot.slane %v3579_v16, %v3582_v22 }
 0x10e   :  { %2299 = vmatmul.mubr.msk.bf16.vlgmr.msra.gmra.mrb[4].mxu1 %vm1241_vm0, %v3285_v25  ;;  %v244_v25 = vrot.slane %v3579_v16, %v3574_v0  ;;  %v1649_v16 = vld [vmem:[%s3706_s4] sm:$0x3] }
 0x115   :  { %v1279_v58 = vpop.f32.mrb[0].mxu1 }
 0x116   :  { %v1281_v59 = vpop.f32.mrb[1].mxu1  ;;  %v1280_v2 = vadd.f32 %v1279_v58, %v244_v25 }
 0x117   :  { %v1283_v60 = vpop.f32.mrb[2].mxu1  ;;  %v1282_v3 = vadd.f32 %v1281_v59, %v248_v1 }
 0x118   :  { %v1284_v61 = vpop.f32.mrb[3].mxu1 }
 0x162   :  { %v1402_v4 = vpop.f32.mrb[0].mxu0 }
 0x163   :  { %v2366_v5 = vadd.f32 %v1402_v4, %v1280_v2  ;;  %v1404_v6 = vpop.f32.mrb[1].mxu0  ;;  %v1658_v4 = vrot.slane %v1649_v16, %v3582_v22 }
 0x164   :  { %v2368_v7 = vadd.f32 %v1404_v6, %v1282_v3  ;;  %v1406_v9 = vpop.f32.mrb[2].mxu0  ;;  %v1654_v3 = vrot.slane %v1649_v16, %v3574_v0  ;;  %v2067_v6 = vld [vmem:[%s3707_s5] sm:$0x3] }
 0x165   :  { %v1573_v10 = vmul.f32 0.2, %v2366_v5  ;;  %v1407_v12 = vpop.f32.mrb[3].mxu0 }
 0x166   :  { %v1574_v13 = vmul.f32 0.2, %v2368_v7 }
 0x167   :  { %v1577_v14 = vmax.f32 %v2366_v5, %v1573_v10 }
 0x168   :  { %v1578_v15 = vmax.f32 %v2368_v7, %v1574_v13 }
 0x169   :  { %v1581_v11 = vpack.c.bf16 %v1577_v14, %v1577_v14 }
 0x16a   :  { %v1582_v17 = vpack.c.bf16 %v1578_v15, %v1578_v15  ;;  %v2072_v15 = vrot.slane %v2067_v6, %v3574_v0 }
 0x16c   :  { %2013 = vmatprep.mubr.bf16.mxu0 %v1582_v17 }
 0x16d   :  { %2014 = vmatmul.mubr.bf16.vlgmr.msra.gmra.mrb[4].mxu0 %v1581_v11 }
 0x16e   :  { %2023 = vmatpush1.bf16.msra.mxu0 %v2740_v18  ;;  %v2076_v18 = vrot.slane %v2067_v6, %v3582_v22 }
 0x16f   :  { %2024 = vmatprep.subr.bf16.mxu0 %v2745_v19 }
 0x172   :  { %2025 = vmatpush1.bf16.msra.mxu0 %v2743_v35 }
 0x173   :  { %2026 = vmatprep.subr.bf16.mxu0 %v2748_v20 }
 0x176   :  { %2027 = vmatpush1.bf16.msra.mxu0 %v2746_v21 }
 0x177   :  { %2028 = vmatprep.subr.bf16.mxu0 %v2751_v8  ;;  %v2364_v8 = vld [vmem:[#allocation2] ss:$0 sm:$0xff] }
 0x17a   :  { %2029 = vmatpush1.bf16.msra.mxu0 %v2749_v23 }
 0x17b   :  { %2030 = vmatprep.subr.bf16.mxu0 %v2754_v24 }
 0x17e   :  { %2031 = vmatpush1.bf16.msra.mxu0 %v2752_v52 }
 0x17f   :  { %2032 = vmatprep.subr.bf16.mxu0 %v2757_v26 }
 0x182   :  { %2033 = vmatpush1.bf16.msra.mxu0 %v2755_v27 }
 0x183   :  { %2034 = vmatprep.subr.bf16.mxu0 %v2760_v28 }
 0x186   :  { %2035 = vmatpush1.bf16.msra.mxu0 %v2758_v29 }
 0x187   :  { %2036 = vmatprep.subr.bf16.mxu0 %v2763_v30 }
 0x18a   :  { %2037 = vmatpush1.bf16.msra.mxu0 %v2761_v31 }
 0x18b   :  { %2038 = vmatprep.subr.bf16.mxu0 %v2766_v32 }
 0x18e   :  { %2039 = vmatpush1.bf16.msra.mxu0 %v2764_v33 }
 0x18f   :  { %2040 = vmatprep.subr.bf16.mxu0 %v2769_v34 }
 0x192   :  { %2041 = vmatpush1.bf16.msra.mxu0 %v2767_v36 }
 0x193   :  { %2042 = vmatprep.subr.bf16.mxu0 %v2772_v37 }
 0x196   :  { %2043 = vmatpush1.bf16.msra.mxu0 %v2770_v38 }
 0x197   :  { %2044 = vmatprep.subr.bf16.mxu0 %v2775_v39 }
 0x19a   :  { %2045 = vmatpush1.bf16.msra.mxu0 %v2773_v40 }
 0x19b   :  { %2046 = vmatprep.subr.bf16.mxu0 %v2778_v41 }
 0x19e   :  { %2047 = vmatpush1.bf16.msra.mxu0 %v2776_v42 }
 0x19f   :  { %2048 = vmatprep.subr.bf16.mxu0 %v2781_v43 }
 0x1a2   :  { %2049 = vmatpush1.bf16.msra.mxu0 %v2779_v44 }
 0x1a3   :  { %2050 = vmatprep.subr.bf16.mxu0 %v2784_v45 }
 0x1a6   :  { %2051 = vmatpush1.bf16.msra.mxu0 %v2782_v46 }
 0x1a7   :  { %2052 = vmatprep.subr.bf16.mxu0 %v2787_v47 }
 0x1aa   :  { %2053 = vmatpush1.bf16.msra.mxu0 %v2785_v48 }
 0x1e1   :  { %v1566_v54 = vpop.f32.mrb[4].mxu1 }
 0x1e2   :  { %v2369_v55 = vadd.f32 %v1566_v54, %v252_v51  ;;  %v1568_v56 = vpop.f32.mrb[5].mxu1 }
 0x1e3   :  { %v2370_v57 = vadd.f32 %v1568_v56, %v256_v53  ;;  %v1570_v58 = vpop.f32.mrb[6].mxu1 }
 0x1e4   :  { %v1575_v59 = vmul.f32 0.2, %v2369_v55  ;;  %v1571_v60 = vpop.f32.mrb[7].mxu1 }
 0x1e5   :  { %v1576_v61 = vmul.f32 0.2, %v2370_v57 }
 0x1e6   :  { %v1579_v62 = vmax.f32 %v2369_v55, %v1575_v59 }
 0x1e7   :  { %v1580_v25 = vmax.f32 %v2370_v57, %v1576_v61 }
 0x1e8   :  { %v1583_v2 = vpack.c.bf16 %v1579_v62, %v1579_v62 }
 0x1e9   :  { %v1584_v1 = vpack.c.bf16 %v1580_v25, %v1580_v25 }
 0x1eb   :  { %2054 = vmatprep.mubr.bf16.mxu0 %v1584_v1 }
 0x1ec   :  { %2055 = vmatmul.mubr.bf16.vlgmr.msra.gmra.mrb[4].mxu0 %v1583_v2 }
 0x2bf   :  { %v2056_v5 = vpop.f32.mrb[4].mxu0 }
 0x2c0   :  { %v2371_v7 = vadd.f32 %v2056_v5, %v1654_v3  ;;  %v2058_v9 = vpop.f32.mrb[5].mxu0 }
 0x2c1   :  { %v2372_v10 = vadd.f32 %v2058_v9, %v1658_v4  ;;  %v2060_v12 = vpop.f32.mrb[6].mxu0 }
 0x2c2   :  { %v2063_v13 = vmul.f32 0.2, %v2371_v7  ;;  %v2061_v14 = vpop.f32.mrb[7].mxu0 }
 0x2c3   :  { %v2064_v17 = vmul.f32 0.2, %v2372_v10 }
 0x2c4   :  { %v2065_v11 = vmax.f32 %v2371_v7, %v2063_v13 }
 0x2c5   :  { %v2066_v19 = vmax.f32 %v2372_v10, %v2064_v17 }
 0x2c6   :  { %v2079_v35 = vmul.f32 %v2072_v15, %v2065_v11 }
 0x2c7   :  { %v2080_v20 = vmul.f32 %v2076_v18, %v2066_v19 }
 0x2c9   :  { %v2081_v21 = vadd.f32 %v2080_v20, %v2079_v35 }
 0x2cb   :  { %2082 = vadd.xlane.f32.xlu0 %v2081_v21 }
 0x358   :  { %v2083_v23 = vpop.xlane.xlu0 %2082 }
 0x359   :  { %v2091_v24 = vadd.f32 %v2364_v8, %v2083_v23 }
 0x35b   :  { %v2092_v52 = vmul.f32 0.5, %v2091_v24 }
 0x35d   :  { %2788 = vtanh.f32 %v2092_v52 }
 0x367   :  { %v2789_v26 = vpop.eup %2788 }
 0x368   :  { %v2094_v27 = vadd.f32 1.0, %v2789_v26 }
 0x36a   :  { %v2095_v28 = vmul.f32 0.5, %v2094_v27 }
 0x36c   :  { %2097 = vst.msk [vmem:[%s3708_s7] sm:$0xff] %vm2096_vm1, %v2095_v28 }

</bundles_post_ra>
